<compile_context>
chip_gen: v5e
topology: v5e:2x2
jax: 0.10.0
libtpu: 0.0.40
codegen_flags: <defaults>
</compile_context>

<pallas_src>
import math
import functools

import jax
import jax.numpy as jnp
from jax.experimental import pallas as pl
from jax.experimental.pallas import tpu as pltpu


# ----------------------------- shared helpers ------------------------------

def _layernorm(v, eps=1e-6):
    # elementwise_affine=False LayerNorm over the last dim (f32)
    mu = jnp.mean(v, axis=-1, keepdims=True)
    var = jnp.mean((v - mu) ** 2, axis=-1, keepdims=True)
    return (v - mu) * jax.lax.rsqrt(var + eps)


def _gelu_tanh(v):
    # nn.GELU(approximate='tanh')
    c0 = math.sqrt(2.0 / math.pi)
    return 0.5 * v * (1.0 + jnp.tanh(c0 * (v + 0.044715 * v * v * v)))


# --------------------------- kernel 1: qkv proj -----------------------------
# grid = (B, N // Tq); computes qkv = modulate(LN(x_tile)) @ W_qkv + b_qkv
# (attention scale already folded into the q-columns of W_qkv).

def _qkv_kernel(x_ref, mod_ref, w_qkv_ref, b_qkv_ref, q_ref, k_ref, v_ref):
    D = x_ref.shape[-1]
    x = x_ref[0].astype(jnp.float32)          # (Tq, D)
    m = mod_ref[0].astype(jnp.float32)        # (6, D)
    shift_msa, scale_msa = m[0:1], m[1:2]

    h = _layernorm(x) * (1.0 + scale_msa) + shift_msa            # f32
    qkv = jnp.dot(h.astype(jnp.bfloat16), w_qkv_ref[...],
                  preferred_element_type=jnp.float32) + b_qkv_ref[...]   # (Tq, 3D)

    q_ref[0] = qkv[:, 0 * D:1 * D].astype(q_ref.dtype)
    k_ref[0] = qkv[:, 1 * D:2 * D].astype(k_ref.dtype)
    v_ref[0] = qkv[:, 2 * D:3 * D].astype(v_ref.dtype)


# ----------------- kernel 2: attention + proj + MLP + residuals -------------
# grid = (B, N // Tq); per q-tile, K/V for the batch element stay resident.

def _attn_mlp_kernel(x_ref, mod_ref, q_ref, k_ref, v_ref,
                     w_proj_ref, b_proj_ref,
                     w_fc1_ref, b_fc1_ref,
                     w_fc2_ref, b_fc2_ref,
                     o_ref, *, num_heads):
    D = x_ref.shape[-1]
    hd = D // num_heads

    x = x_ref[0].astype(jnp.float32)          # (Tq, D)
    m = mod_ref[0].astype(jnp.float32)        # (6, D)
    gate_msa, shift_mlp, scale_mlp, gate_mlp = m[2:3], m[3:4], m[4:5], m[5:6]

    # ------------- multi-head attention (head-major, batched) -------------
    q = q_ref[0].astype(jnp.float32)          # (Tq, D)  scale folded in already
    k = k_ref[0].astype(jnp.float32)          # (N,  D)
    v = v_ref[0].astype(jnp.float32)          # (N,  D)

    def heads(t):                             # (R, D) -> (H, R, hd)
        return jnp.stack([t[:, h * hd:(h + 1) * hd] for h in range(num_heads)],
                         axis=0)

    q3 = heads(q).astype(jnp.bfloat16)        # (H, Tq, hd)
    k3 = heads(k).astype(jnp.bfloat16)        # (H, N,  hd)
    v3 = heads(v).astype(jnp.bfloat16)        # (H, N,  hd)

    # q.k^T contracting the last axes directly (no explicit transpose).
    s = jnp.einsum('hqd,hkd->hqk', q3, k3,
                   preferred_element_type=jnp.float32)           # (H, Tq, N)
    s = s - jnp.max(s, axis=-1, keepdims=True)
    p = jnp.exp(s)
    p = p * pl.reciprocal(jnp.sum(p, axis=-1, keepdims=True), approx=True)
    o3 = jnp.einsum('hqk,hkd->hqd', p.astype(jnp.bfloat16), v3,
                    preferred_element_type=jnp.float32)          # (H, Tq, hd)

    # Output projection accumulated per head:
    #   attn @ W_proj == sum_h o3[h] @ W_proj[h*hd:(h+1)*hd, :]
    # (W_proj is passed pre-reshaped to (H, hd, D) so each slab is a clean
    #  leading-axis load — no lane-concat of hd-wide slices needed.)
    acc = None
    for h in range(num_heads):
        part = jnp.dot(o3[h].astype(jnp.bfloat16), w_proj_ref[h],
                       preferred_element_type=jnp.float32)
        acc = part if acc is None else acc + part
    attn_out = acc + b_proj_ref[...]

    x = x + gate_msa * attn_out

    # ------------------------------ MLP -----------------------------------
    h2 = _layernorm(x) * (1.0 + scale_mlp) + shift_mlp
    hid = jnp.dot(h2.astype(jnp.bfloat16), w_fc1_ref[...],
                  preferred_element_type=jnp.float32) + b_fc1_ref[...]
    hid = _gelu_tanh(hid)
    mlp_out = jnp.dot(hid.astype(jnp.bfloat16), w_fc2_ref[...],
                      preferred_element_type=jnp.float32) + b_fc2_ref[...]
    x = x + gate_mlp * mlp_out

    o_ref[0] = x.astype(o_ref.dtype)


# --------------------------------- wrapper ----------------------------------

def dit_block(x, c, params, num_heads, *, q_tile=128):
    B, N, D = x.shape
    assert D % num_heads == 0
    hd = D // num_heads
    scale = hd ** -0.5

    # ---- hoisted adaLN modulation: one XLA matmul for the whole batch ----
    c_silu = c * jax.nn.sigmoid(c)
    mod = (c_silu @ params["w_ada"] + params["b_ada"]).reshape(B, 6, D)
    mod = mod.astype(jnp.float32)

    # ---- fold attention scale into the q-columns of the qkv projection ----
    col_scale = jnp.concatenate([jnp.full((D,), scale, jnp.float32),
                                 jnp.ones((2 * D,), jnp.float32)])
    w_qkv = (params["w_qkv"].astype(jnp.float32) * col_scale[None, :]
             ).astype(jnp.bfloat16)
    b_qkv = params["b_qkv"].astype(jnp.float32) * col_scale[None, :]

    # bf16 weights (MXU operands); f32 biases (added post-accumulation).
    w_proj = params["w_proj"].reshape(num_heads, hd, D).astype(jnp.bfloat16)
    b_proj = params["b_proj"].astype(jnp.float32)
    w_fc1 = params["w_fc1"].astype(jnp.bfloat16)
    b_fc1 = params["b_fc1"].astype(jnp.float32)
    w_fc2 = params["w_fc2"].astype(jnp.bfloat16)
    b_fc2 = params["b_fc2"].astype(jnp.float32)

    Tq = min(q_tile, N)
    assert N % Tq == 0, "sequence length must be divisible by the token tile"
    grid = (B, N // Tq)

    def full_spec(a):
        nd = a.ndim
        return pl.BlockSpec(a.shape, lambda b, t, _nd=nd: (0,) * _nd)

    compiler_params = pltpu.CompilerParams(
        dimension_semantics=("parallel", "parallel"),
        vmem_limit_bytes=48 * 1024 * 1024,
    )

    # ---------------- kernel 1: token-tiled qkv projection -----------------
    q, k, v = pl.pallas_call(
        _qkv_kernel,
        out_shape=tuple(jax.ShapeDtypeStruct((B, N, D), jnp.bfloat16)
                        for _ in range(3)),
        grid=grid,
        in_specs=[
            pl.BlockSpec((1, Tq, D), lambda b, t: (b, t, 0)),   # x tile
            pl.BlockSpec((1, 6, D), lambda b, t: (b, 0, 0)),    # modulation rows
            full_spec(w_qkv),
            full_spec(b_qkv),
        ],
        out_specs=tuple(pl.BlockSpec((1, Tq, D), lambda b, t: (b, t, 0))
                        for _ in range(3)),
        compiler_params=compiler_params,
    )(x, mod, w_qkv, b_qkv)

    # ---- kernel 2: attention (K/V resident, q tiled) + proj + MLP ----------
    kernel2 = functools.partial(_attn_mlp_kernel, num_heads=num_heads)
    out = pl.pallas_call(
        kernel2,
        out_shape=jax.ShapeDtypeStruct((B, N, D), x.dtype),
        grid=grid,
        in_specs=[
            pl.BlockSpec((1, Tq, D), lambda b, t: (b, t, 0)),   # x tile
            pl.BlockSpec((1, 6, D), lambda b, t: (b, 0, 0)),    # modulation rows
            pl.BlockSpec((1, Tq, D), lambda b, t: (b, t, 0)),   # q tile
            pl.BlockSpec((1, N, D), lambda b, t: (b, 0, 0)),    # full K (resident)
            pl.BlockSpec((1, N, D), lambda b, t: (b, 0, 0)),    # full V (resident)
            full_spec(w_proj), full_spec(b_proj),
            full_spec(w_fc1), full_spec(b_fc1),
            full_spec(w_fc2), full_spec(b_fc2),
        ],
        out_specs=pl.BlockSpec((1, Tq, D), lambda b, t: (b, t, 0)),
        compiler_params=compiler_params,
    )(x, mod, q, k, v, w_proj, b_proj, w_fc1, b_fc1, w_fc2, b_fc2)
    return out


# --------------------------- pure-JAX reference -----------------------------
# Same numerics policy as the kernel: bf16 matmul operands, f32 accumulation,
# f32 LayerNorm / softmax statistics; module semantics otherwise unchanged.

def dit_block_ref(x, c, params, num_heads):
    B, N, D = x.shape
    hd = D // num_heads
    scale = hd ** -0.5
    bf16, f32 = jnp.bfloat16, jnp.float32

    def mm(a, w):
        return jnp.dot(a.astype(bf16), w.astype(bf16), preferred_element_type=f32)

    c_silu = c * jax.nn.sigmoid(c)
    ada = c_silu @ params["w_ada"] + params["b_ada"]
    (shift_msa, scale_msa, gate_msa,
     shift_mlp, scale_mlp, gate_mlp) = jnp.split(ada, 6, axis=1)

    def modulate(v, shift, scl):
        return v * (1.0 + scl[:, None, :]) + shift[:, None, :]

    h = modulate(_layernorm(x), shift_msa, scale_msa)
    qkv = mm(h, params["w_qkv"]) + params["b_qkv"][0]
    q, k, v = jnp.split(qkv, 3, axis=-1)
    q = q.reshape(B, N, num_heads, hd).transpose(0, 2, 1, 3) * scale
    k = k.reshape(B, N, num_heads, hd).transpose(0, 2, 1, 3)
    v = v.reshape(B, N, num_heads, hd).transpose(0, 2, 1, 3)
    s = jnp.einsum("bhqd,bhkd->bhqk", q.astype(bf16), k.astype(bf16),
                   preferred_element_type=f32)
    p = jax.nn.softmax(s, axis=-1)
    o = jnp.einsum("bhqk,bhkd->bhqd", p.astype(bf16), v.astype(bf16),
                   preferred_element_type=f32)
    o = o.transpose(0, 2, 1, 3).reshape(B, N, D)
    attn_out = mm(o, params["w_proj"]) + params["b_proj"][0]
    x = x + gate_msa[:, None, :] * attn_out

    h2 = modulate(_layernorm(x), shift_mlp, scale_mlp)
    hid = _gelu_tanh(mm(h2, params["w_fc1"]) + params["b_fc1"][0])
    mlp_out = mm(hid, params["w_fc2"]) + params["b_fc2"][0]
    x = x + gate_mlp[:, None, :] * mlp_out
    return x


# ----------------------------------- main ------------------------------------

if __name__ == "__main__":
    B, N, D = 2, 8, 32          # batch, tokens, hidden_size
    num_heads = 4
    mlp_ratio = 4.0
    mlp_hidden = int(D * mlp_ratio)

    key = jax.random.PRNGKey(0)
    keys = jax.random.split(key, 12)

    def init(k_, shape, fan_in):
        return jax.random.normal(k_, shape, jnp.float32) / math.sqrt(fan_in)

    params = {
        "w_ada":  init(keys[0], (D, 6 * D), D),
        "b_ada":  init(keys[1], (1, 6 * D), D),
        "w_qkv":  init(keys[2], (D, 3 * D), D),
        "b_qkv":  init(keys[3], (1, 3 * D), D),
        "w_proj": init(keys[4], (D, D), D),
        "b_proj": init(keys[5], (1, D), D),
        "w_fc1":  init(keys[6], (D, mlp_hidden), D),
        "b_fc1":  init(keys[7], (1, mlp_hidden), D),
        "w_fc2":  init(keys[8], (mlp_hidden, D), mlp_hidden),
        "b_fc2":  init(keys[9], (1, D), mlp_hidden),
    }

    x = jax.random.normal(keys[10], (B, N, D), jnp.float32)
    c = jax.random.normal(keys[11], (B, D), jnp.float32)

    out = dit_block(x, c, params, num_heads)
    out = jax.block_until_ready(out)

    ref = dit_block_ref(x, c, params, num_heads)
    assert out.shape == (B, N, D)
    err = float(jnp.max(jnp.abs(out - ref)))
    assert jnp.allclose(out, ref, rtol=5e-2, atol=5e-2), f"max abs err {err}"

    print("KERNEL_OK")
</pallas_src>

<mosaic_0001>
module attributes {stable_mosaic.version = 11 : i64} {
  func.func @_qkv_kernel(%arg0: i32, %arg1: i32, %arg2: memref<1x8x32xf32, #tpu.memory_space<vmem>>, %arg3: memref<1x6x32xf32, #tpu.memory_space<vmem>>, %arg4: memref<32x96xbf16, #tpu.memory_space<vmem>>, %arg5: memref<1x96xf32, #tpu.memory_space<vmem>>, %arg6: memref<1x8x32xbf16, #tpu.memory_space<vmem>>, %arg7: memref<1x8x32xbf16, #tpu.memory_space<vmem>>, %arg8: memref<1x8x32xbf16, #tpu.memory_space<vmem>>) attributes {dimension_semantics = [#tpu.dimension_semantics<parallel>, #tpu.dimension_semantics<parallel>], iteration_bounds = array<i64: 2, 1>, scalar_prefetch = 0 : i64, scratch_operands = 0 : i64, tpu.core_type = #tpu.core_type<tc>, window_params = [{transform_indices = @transform_0, window_bounds = array<i64: 1, 8, 32>}, {transform_indices = @transform_1, window_bounds = array<i64: 1, 6, 32>}, {pipeline_mode = #tpu.pipeline_mode<synchronous>, transform_indices = @transform_2, window_bounds = array<i64: 32, 96>}, {pipeline_mode = #tpu.pipeline_mode<synchronous>, transform_indices = @transform_3, window_bounds = array<i64: 1, 96>}, {transform_indices = @transform_4, window_bounds = array<i64: 1, 8, 32>}, {transform_indices = @transform_5, window_bounds = array<i64: 1, 8, 32>}, {transform_indices = @transform_6, window_bounds = array<i64: 1, 8, 32>}]} {
    %c0 = arith.constant 0 : index
    %c0_0 = arith.constant 0 : index
    %c0_1 = arith.constant 0 : index
    %0 = vector.load %arg2[%c0, %c0_0, %c0_1] : memref<1x8x32xf32, #tpu.memory_space<vmem>>, vector<1x8x32xf32>
    %1 = vector.shape_cast %0 : vector<1x8x32xf32> to vector<8x32xf32>
    %c0_2 = arith.constant 0 : index
    %c0_3 = arith.constant 0 : index
    %c0_4 = arith.constant 0 : index
    %2 = vector.load %arg3[%c0_2, %c0_3, %c0_4] : memref<1x6x32xf32, #tpu.memory_space<vmem>>, vector<1x6x32xf32>
    %3 = vector.shape_cast %2 : vector<1x6x32xf32> to vector<6x32xf32>
    %4 = vector.extract_strided_slice %3 {offsets = [0, 0], sizes = [1, 32], strides = [1, 1]} : vector<6x32xf32> to vector<1x32xf32>
    %5 = vector.extract_strided_slice %3 {offsets = [1, 0], sizes = [1, 32], strides = [1, 1]} : vector<6x32xf32> to vector<1x32xf32>
    %cst = arith.constant dense<0.000000e+00> : vector<8xf32>
    %6 = vector.multi_reduction <add>, %1, %cst [1] : vector<8x32xf32> to vector<8xf32>
    %7 = vector.shape_cast %6 : vector<8xf32> to vector<8x1xf32>
    %cst_5 = arith.constant 3.200000e+01 : f32
    %8 = vector.broadcast %cst_5 : f32 to vector<8x1xf32>
    %9 = arith.divf %7, %8 : vector<8x1xf32>
    %10 = vector.broadcast %9 : vector<8x1xf32> to vector<8x32xf32>
    %11 = arith.subf %1, %10 : vector<8x32xf32>
    %12 = arith.mulf %11, %11 : vector<8x32xf32>
    %cst_6 = arith.constant dense<0.000000e+00> : vector<8xf32>
    %13 = vector.multi_reduction <add>, %12, %cst_6 [1] : vector<8x32xf32> to vector<8xf32>
    %14 = vector.shape_cast %13 : vector<8xf32> to vector<8x1xf32>
    %cst_7 = arith.constant 3.200000e+01 : f32
    %15 = vector.broadcast %cst_7 : f32 to vector<8x1xf32>
    %16 = arith.divf %14, %15 : vector<8x1xf32>
    %17 = vector.broadcast %9 : vector<8x1xf32> to vector<8x32xf32>
    %18 = arith.subf %1, %17 : vector<8x32xf32>
    %cst_8 = arith.constant 9.99999997E-7 : f32
    %19 = vector.broadcast %cst_8 : f32 to vector<8x1xf32>
    %20 = arith.addf %16, %19 : vector<8x1xf32>
    %21 = math.rsqrt %20 : vector<8x1xf32>
    %22 = vector.broadcast %21 : vector<8x1xf32> to vector<8x32xf32>
    %23 = arith.mulf %18, %22 : vector<8x32xf32>
    %cst_9 = arith.constant 1.000000e+00 : f32
    %24 = vector.broadcast %cst_9 : f32 to vector<1x32xf32>
    %25 = arith.addf %24, %5 : vector<1x32xf32>
    %26 = vector.broadcast %25 : vector<1x32xf32> to vector<8x32xf32>
    %27 = arith.mulf %23, %26 : vector<8x32xf32>
    %28 = vector.broadcast %4 : vector<1x32xf32> to vector<8x32xf32>
    %29 = arith.addf %27, %28 : vector<8x32xf32>
    %30 = arith.truncf %29 : vector<8x32xf32> to vector<8x32xbf16>
    %c0_10 = arith.constant 0 : index
    %c0_11 = arith.constant 0 : index
    %31 = vector.load %arg4[%c0_10, %c0_11] : memref<32x96xbf16, #tpu.memory_space<vmem>>, vector<32x96xbf16>
    %cst_12 = arith.constant dense<0.000000e+00> : vector<8x96xf32>
    %32 = tpu.matmul %30, %31, %cst_12 {dimension_numbers = #tpu.dot_dimension_numbers<[1], [0], [0], [1], [0, 0, 1, 1], [], []>} : vector<8x32xbf16>, vector<32x96xbf16>, vector<8x96xf32> -> vector<8x96xf32>
    %c0_13 = arith.constant 0 : index
    %c0_14 = arith.constant 0 : index
    %33 = vector.load %arg5[%c0_13, %c0_14] : memref<1x96xf32, #tpu.memory_space<vmem>>, vector<1x96xf32>
    %34 = vector.broadcast %33 : vector<1x96xf32> to vector<8x96xf32>
    %35 = arith.addf %32, %34 : vector<8x96xf32>
    %36 = vector.extract_strided_slice %35 {offsets = [0, 0], sizes = [8, 32], strides = [1, 1]} : vector<8x96xf32> to vector<8x32xf32>
    %37 = arith.truncf %36 : vector<8x32xf32> to vector<8x32xbf16>
    %c0_15 = arith.constant 0 : index
    %c0_16 = arith.constant 0 : index
    %c0_17 = arith.constant 0 : index
    %38 = vector.load %arg6[%c0_15, %c0_16, %c0_17] : memref<1x8x32xbf16, #tpu.memory_space<vmem>>, vector<1x8x32xbf16>
    %39 = vector.shape_cast %38 : vector<1x8x32xbf16> to vector<8x32xbf16>
    %40 = vector.shape_cast %37 : vector<8x32xbf16> to vector<1x8x32xbf16>
    tpu.vector_store %arg6[%c0_15, %c0_16, %c0_17], %40 {strides = array<i32>} : memref<1x8x32xbf16, #tpu.memory_space<vmem>>, vector<1x8x32xbf16>,
    %41 = vector.extract_strided_slice %35 {offsets = [0, 32], sizes = [8, 32], strides = [1, 1]} : vector<8x96xf32> to vector<8x32xf32>
    %42 = arith.truncf %41 : vector<8x32xf32> to vector<8x32xbf16>
    %c0_18 = arith.constant 0 : index
    %c0_19 = arith.constant 0 : index
    %c0_20 = arith.constant 0 : index
    %43 = vector.load %arg7[%c0_18, %c0_19, %c0_20] : memref<1x8x32xbf16, #tpu.memory_space<vmem>>, vector<1x8x32xbf16>
    %44 = vector.shape_cast %43 : vector<1x8x32xbf16> to vector<8x32xbf16>
    %45 = vector.shape_cast %42 : vector<8x32xbf16> to vector<1x8x32xbf16>
    tpu.vector_store %arg7[%c0_18, %c0_19, %c0_20], %45 {strides = array<i32>} : memref<1x8x32xbf16, #tpu.memory_space<vmem>>, vector<1x8x32xbf16>,
    %46 = vector.extract_strided_slice %35 {offsets = [0, 64], sizes = [8, 32], strides = [1, 1]} : vector<8x96xf32> to vector<8x32xf32>
    %47 = arith.truncf %46 : vector<8x32xf32> to vector<8x32xbf16>
    %c0_21 = arith.constant 0 : index
    %c0_22 = arith.constant 0 : index
    %c0_23 = arith.constant 0 : index
    %48 = vector.load %arg8[%c0_21, %c0_22, %c0_23] : memref<1x8x32xbf16, #tpu.memory_space<vmem>>, vector<1x8x32xbf16>
    %49 = vector.shape_cast %48 : vector<1x8x32xbf16> to vector<8x32xbf16>
    %50 = vector.shape_cast %47 : vector<8x32xbf16> to vector<1x8x32xbf16>
    tpu.vector_store %arg8[%c0_21, %c0_22, %c0_23], %50 {strides = array<i32>} : memref<1x8x32xbf16, #tpu.memory_space<vmem>>, vector<1x8x32xbf16>,
    return
  }
  func.func @transform_0(%arg0: i32, %arg1: i32) -> (i32, i32, i32) {
    %c0_i32 = arith.constant 0 : i32
    %c0_i32_0 = arith.constant 0 : i32
    return %arg0, %arg1, %c0_i32 : i32, i32, i32
  }
  func.func @transform_1(%arg0: i32, %arg1: i32) -> (i32, i32, i32) {
    %c0_i32 = arith.constant 0 : i32
    %c0_i32_0 = arith.constant 0 : i32
    %c0_i32_1 = arith.constant 0 : i32
    return %arg0, %c0_i32, %c0_i32_0 : i32, i32, i32
  }
  func.func @transform_2(%arg0: i32, %arg1: i32) -> (i32, i32) {
    %c0_i32 = arith.constant 0 : i32
    %c0_i32_0 = arith.constant 0 : i32
    %c0_i32_1 = arith.constant 0 : i32
    return %c0_i32, %c0_i32_0 : i32, i32
  }
  func.func @transform_3(%arg0: i32, %arg1: i32) -> (i32, i32) {
    %c0_i32 = arith.constant 0 : i32
    %c0_i32_0 = arith.constant 0 : i32
    %c0_i32_1 = arith.constant 0 : i32
    return %c0_i32, %c0_i32_0 : i32, i32
  }
  func.func @transform_4(%arg0: i32, %arg1: i32) -> (i32, i32, i32) {
    %c0_i32 = arith.constant 0 : i32
    %c0_i32_0 = arith.constant 0 : i32
    return %arg0, %arg1, %c0_i32 : i32, i32, i32
  }
  func.func @transform_5(%arg0: i32, %arg1: i32) -> (i32, i32, i32) {
    %c0_i32 = arith.constant 0 : i32
    %c0_i32_0 = arith.constant 0 : i32
    return %arg0, %arg1, %c0_i32 : i32, i32, i32
  }
  func.func @transform_6(%arg0: i32, %arg1: i32) -> (i32, i32, i32) {
    %c0_i32 = arith.constant 0 : i32
    %c0_i32_0 = arith.constant 0 : i32
    return %arg0, %arg1, %c0_i32 : i32, i32, i32
  }
}

</mosaic_0001>

<bundles_post_ra>
// kernel: tpu_custom_call.1
= control target key start
LH: loop header
LB: loop body
LE: loop exit
PB: predicated region body
PF: predicated region fallthrough
CT: control target
= control target key end

     0   :  { %s1132_s0 = inlined_call_operand.vmem [shape: f32[2,8,32], index: 0, kind: input, shape index: {}]   ;;  %s1133_s1 = inlined_call_operand.vmem [shape: f32[2,6,32], index: 1, kind: input, shape index: {}]   ;;  %s1134_s2 = inlined_call_operand.hbm [shape: bf16[32,96], index: 2, kind: input, shape index: {}]   ;;  %s1135_s3 = inlined_call_operand.vmem [shape: f32[1,96], index: 3, kind: input, shape index: {}]   ;;  %s1136_s4 = inlined_call_operand.hbm [shape: bf16[2,8,32], index: 4, kind: output, shape index: {0}]   ;;  %s1137_s5 = inlined_call_operand.hbm [shape: bf16[2,8,32], index: 5, kind: output, shape index: {1}]   ;;  %s1138_s6 = inlined_call_operand.hbm [shape: bf16[2,8,32], index: 6, kind: output, shape index: {2}]  }
   0x1   :  { %1140 = sst [smem:[#allocation12_spill]] %s1132_s0 }
   0x2   :  { %1141 = sst [smem:[#allocation13_spill]] %s1133_s1 }
   0x3   :  { %12 = vsyncpa [#allocation3], 0 }
   0x4   :  { %13 = vsyncpa [#allocation4], 0 }
   0x5   :  { %15 = vsyncpa [#allocation4 + $0x1], 0 }
   0x6   :  { %16 = vsyncpa [#allocation7], 0 }
   0x7   :  { %18 = vsyncpa [#allocation7 + $0x1], 0  ;;  %s964_s21 = smov 0   ;;  %s966_s22 = smov 0  }
   0x8   :  { %s968_s23 = smov 0   ;;  %s970_s24 = smov 0  }
   0x9   :  { %s972_s25 = smov 0   ;;  %s974_s26 = smov 0  }
   0xa LB: > { %s995_s27 = sadd.s32 4294967295, %s921_s26   ;;  %s1139_s28 = sadd.s32 4294967294, %s921_s26   ;;  %s921_s26 = sphi %s974_s26, %s24_s26   ;;  %s917_s25 = sphi %s972_s25, %s1151_s25   ;;  %s913_s24 = sphi %s970_s24, %s1150_s24   ;;  %s909_s23 = sphi %s968_s23, %s1149_s23   ;;  %s905_s22 = sphi %s966_s22, %s1148_s22   ;;  %s901_s21 = sphi %s964_s21, %s1147_s21  }
   0xb   : > { %s36_s29 = sadd.s32 1, %s917_s25  ;;  %s141_s30 = sadd.s32 1, %s909_s23 }
   0xc   : > { %p38_p0 = scmp.ge.s32.totalorder %s36_s29, 2  ;;  %p151_p1 = scmp.ne.s32.totalorder %s909_s23, %s905_s22 }
   0xd   : > { %p152_p2 = scmp.eq.s32.totalorder %s995_s27, 1  ;;  %p157_p3 = scmp.ne.s32.totalorder %s905_s22, %s901_s21 }
   0xe   : > { %s1153_s29 = smov (%p38_p0, %s36_s29), 0  ;;  %p158_p5 = scmp.eq.s32.totalorder %s1139_s28, 1 }
   0xf   : > { %p1007_p4 = por %p152_p2, %p151_p1  ;;  %s136_s8 = ssub.s32 %s917_s25, %s1153_s29 }
  0x10   : > { %p634_p6 = scmp.ge.s32.totalorder %s921_s26, 1  ;;  %p139_p7 = scmp.eq.s32.totalorder %s136_s8, 0 }
  0x11   : > { %p1016_p8 = por %p158_p5, %p157_p3  ;;  %p221_p9 = scmp.lt.s32.totalorder %s921_s26, 3 }
  0x12   : > { %s1022_s10 = scalar_select %p139_p7, %s909_s23, %s141_s30  }
  0x13   : > { %p222_p10 = pnand %p634_p6, %p221_p9  ;;  %p687_p11 = scmp.eq.s32.totalorder %s995_s27, 0 }
  0x14   : > { %s232_s13 = sshll.u32 %s1134_s2, 4  ;;  %s923_s14 = smov [#allocation2]   ;;  %s233_s13 = int_to_ptr.hbm [resolvable:$true] %s232_s13 }
  0x15   : > { %p673_p12 = pneg %p222_p10  ;;  %s234_s15 = sshll.u32 %s923_s14, 4  ;;  %s235_s15 = int_to_ptr.vmem [resolvable:$true] %s234_s15 }
  0x16   : > { %s924_s16 = smov 64   ;;  %s925_s17 = smov 4  }
  0x17   : > { %p674_p13 = pnand %p687_p11, %p673_p12  ;;  %270 = sbr.rel (%p222_p10) target bundleno = 568 (0x238), region = 36 }
  0x19   : > { %676 = dma.hbm_to_vmem [thread:$0]  (!%p674_p13), %s233_s13, 256, %s235_s15, [#allocation3], %s924_s16, %s924_s16, %s925_s17  }
  0x1c   : > { %888 = dma.done.wait (%p687_p11), [#allocation3], 256  }
  0x1d   : > { %890 = vsyncadd (%p687_p11), [#allocation3], 4294967040  ;;  %p317_p0 = scmp.lt.s32.totalorder %s913_s24, 1  ;;  %s1144_s0 = sld [smem:[#allocation12_spill]]  ;;  %vm331_vm0 = vcmask 261120   ;;  %v926_v2 = vmov 32.0  }
  0x1e   : > { %745 = vrcp.f32 %v926_v2  ;;  %v662_v14 = vld [vmem:[#allocation2 + $0x8] sm:$0xff]  ;;  %v661_v15 = vld [vmem:[#allocation2] sm:$0xff]  ;;  %s1145_s1 = sld [smem:[#allocation13_spill]]  ;;  %s300_s14 = sand.u32 1, %s905_s22   ;;  %vm404_vm5 = vcmask 257024  }
  0x1f   : > { %s1030_s18 = scalar_select %p317_p0, %s913_s24, 1  ;;  %396 = vmatpush.bf16.msra.mxu0 %v662_v14  ;;  %v744_v34 = vld [vmem:[%s1135_s3] ss:$0 sm:$0xff] }
  0x20   : > { %s1050_s17 = sshll.u32 %s300_s14, 2  ;;  %s799_s28 = scalar_lea.hbm %s1136_s4, 8 }
  0x21   : > { %s642_s19 = sshll.u32 %s1030_s18, 3  ;;  %s1053_s18 = sshll.u32 %s913_s24, 2 }
  0x22   : > { %s437_s30 = scalar_lea.hbm %s1136_s4, %s1053_s18  ;;  %s416_s24 = scalar_lea.sflag [#allocation4], %s300_s14 }
  0x23   : > { %s323_s8 = scalar_lea.vmem %s1144_s0, %s642_s19  ;;  %397 = vmatpush.bf16.msra.mxu0 %v661_v15  ;;  %s441_s12 = sshll.u32 %s437_s30, 4  ;;  %s442_s12 = int_to_ptr.hbm [resolvable:$true] %s441_s12 }
  0x24   : > { %v329_v0 = vld [vmem:[%s323_s8] sm:$0xff]  ;;  %v746_v3 = vpop.eup %745  ;;  %s327_s13 = scalar_lea.vmem %s1145_s1, %s642_s19  ;;  %s302_s8 = scalar_lea.vmem [#allocation5], %s1050_s17 }
  0x25   : > { %v332_v1 = vsel %vm331_vm0, %v329_v0, 0.0  ;;  %v336_v4 = vmul.f32 32.0, %v746_v3  ;;  %vm340_vm1 = vweird.f32 %v746_v3  ;;  %v330_v21 = vld [vmem:[%s327_s13] sm:$0x3f]  ;;  %s439_s11 = sshll.u32 %s302_s8, 4  ;;  %s927_s13 = smov 96   ;;  %s440_s11 = int_to_ptr.vmem [resolvable:$true] %s439_s11 }
  0x26   : > { %333 = vadd.xlane.f32.xlu0 %v332_v1  ;;  %v361_v24 = vadd.f32 1.0, %v330_v21  ;;  %v364_v29 = vperm.slane %v330_v21, 0  ;;  %s793_s15 = sshra.s32 %s442_s12, 4  ;;  %s794_s15 = int_to_ptr.hbm [resolvable:$true] %s793_s15 }
  0x27   : > { %v337_v5 = vsub.f32 1.0, %v336_v4  ;;  %s795_s16 = scalar_lea.hbm %s794_s15, 4  ;;  %p800_p5 = scmp.lt.s32.totalorder %s794_s15, %s1136_s4 }
  0x28   : > { %v362_v27 = vperm.slane %v361_v24, 1  ;;  %p796_p1 = scmp.ne.s32.totalorder %s794_s15, %s795_s16  ;;  %p801_p6 = scmp.lt.s32.totalorder %s799_s28, %s795_s16 }
  0x29   : > { %v338_v6 = vmul.f32 %v746_v3, %v337_v5 }
  0x2a   : > { %p797_p2 = pnand %p796_p1, %p1007_p4  ;;  %p802_p7 = por %p801_p6, %p800_p5 }
  0x2b   : > { %v339_v7 = vadd.f32 %v746_v3, %v338_v6 }
  0x2c   : > { %p798_p3 = pneg %p797_p2 }
  0x2d   : > { %v341_v8 = vsel %vm340_vm1, %v746_v3, %v339_v7 }
  0x2e   : > { %p803_p9 = pnand %p802_p7, %p798_p3 }
  0x99   : > { %v334_v9 = vpop.xlane.xlu0 %333 }
  0x9a   : > { %v342_v10 = vmul.f32 %v341_v8, %v334_v9 }
  0x9c   : > { %v343_v11 = vsub.f32 %v329_v0, %v342_v10 }
  0x9e   : > { %v344_v12 = vmul.f32 %v343_v11, %v343_v11 }
  0xa0   : > { %v345_v13 = vsel %vm331_vm0, %v344_v12, 0.0 }
  0xa1   : > { %346 = vadd.xlane.f32.xlu0 %v345_v13 }
 0x114   : > { %v347_v16 = vpop.xlane.xlu0 %346 }
 0x115   : > { %v348_v17 = vmul.f32 %v347_v16, %v341_v8 }
 0x117   : > { %v349_v18 = vadd.f32 1e-06, %v348_v17 }
 0x119   : > { %747 = vrsqrt.f32 %v349_v18  ;;  %vm356_vm3 = vweird.f32 %v349_v18 }
 0x11f   : > { %v748_v19 = vpop.eup %747 }
 0x120   : > { %v351_v20 = vmul.f32 %v748_v19, %v349_v18  ;;  %vm357_vm2 = vweird.f32 %v748_v19 }
 0x121   : > { %vm358_vm4 = vmor %vm356_vm3, %vm357_vm2 }
 0x122   : > { %v352_v22 = vmul.f32 %v748_v19, %v351_v20 }
 0x124   : > { %v353_v23 = vmul.f32 0.5, %v352_v22 }
 0x126   : > { %v354_v25 = vsub.f32 1.5, %v353_v23 }
 0x128   : > { %v355_v26 = vmul.f32 %v748_v19, %v354_v25 }
 0x12a   : > { %v359_v28 = vsel %vm358_vm4, %v748_v19, %v355_v26 }
 0x12b   : > { %v360_v30 = vmul.f32 %v359_v28, %v343_v11 }
 0x12d   : > { %v363_v31 = vmul.f32 %v362_v27, %v360_v30 }
 0x12f   : > { %v365_v32 = vadd.f32 %v364_v29, %v363_v31 }
 0x131   : > { %v366_v33 = vpack.c.bf16 %v365_v32, %v365_v32 }
 0x133   : > { %652 = vmatmul.msk.bf16.vlgmr.msra.gmra.mxu0 %vm331_vm0, %v366_v33 }
 0x1b0   : > { %v399_v35 = vpop.f32.mrf.mxu0 }
 0x1b1   : > { %v400_v36 = vadd.f32 %v744_v34, %v399_v35 }
 0x1b3   : > { %v403_v37 = vpack.c.bf16 %v400_v36, %v400_v36 }
 0x1b5   : > { %407 = vrot.lane.b32.xlu1 %v403_v37, %s927_s13  ;;  %405 = vst.msk [vmem:[%s302_s8] sm:$0xf] %vm404_vm5, %v403_v37 }
 0x1b6   : > { %806 = shalt.err (!%p803_p9)
}
 0x1b7   : > { %667 = dma.vmem_to_hbm [thread:$0]  (%p1007_p4), %s440_s11, 64, %s442_s12, %s416_s24  }
 0x1b8   : > { %v401_v38 = vpop.f32.mrf.mxu0  ;;  %s928_s14 = smov 64   ;;  %s452_s0 = scalar_lea.hbm %s1137_s5, %s1053_s18 }
 0x1b9   : > { %s420_s15 = sand.u32 1, %s995_s27   ;;  %s309_s28 = scalar_lea.vmem [#allocation6], %s1050_s17 }
 0x1ba   : > { %s454_s16 = sshll.u32 %s309_s28, 4  ;;  %s456_s19 = sshll.u32 %s452_s0, 4  ;;  %s455_s16 = int_to_ptr.vmem [resolvable:$true] %s454_s16  ;;  %s457_s19 = int_to_ptr.hbm [resolvable:$true] %s456_s19 }
 0x1bb   : > { %s467_s11 = scalar_lea.hbm %s1138_s6, %s1053_s18  ;;  %s1082_s12 = scalar_lea.sflag [#allocation7], %s420_s15 }
 0x1bc   : > { %s821_s24 = sshra.s32 %s457_s19, 4  ;;  %s827_s13 = scalar_lea.hbm %s1137_s5, 8  ;;  %s822_s24 = int_to_ptr.hbm [resolvable:$true] %s821_s24 }
 0x1bd   : > { %411 = vrot.lane.b32.xlu1 %v403_v37, %s928_s14  ;;  %s823_s14 = scalar_lea.hbm %s822_s24, 4  ;;  %p828_p13 = scmp.lt.s32.totalorder %s822_s24, %s1137_s5 }
 0x1be   : > { %p824_p10 = scmp.ne.s32.totalorder %s822_s24, %s823_s14  ;;  %p829_p0 = scmp.lt.s32.totalorder %s827_s13, %s823_s14 }
 0x1c0   : > { %p825_p11 = pnand %p824_p10, %p1007_p4  ;;  %p830_p1 = por %p829_p0, %p828_p13 }
 0x1c2   : > { %p826_p12 = pneg %p825_p11 }
 0x1c4   : > { %p831_p2 = pnand %p830_p1, %p826_p12 }
 0x227   : > { %v408_v39 = vpop.permute.xlu1 %407 }
 0x228   : > { %410 = vst.msk [vmem:[%s309_s28] sm:$0xf] %vm404_vm5, %v408_v39 }
 0x229   : > { %834 = shalt.err (!%p831_p2)
}
 0x22a   : > { %668 = dma.vmem_to_hbm [thread:$0]  (%p1007_p4), %s455_s16, 64, %s457_s19, %s1082_s12  }
 0x22b   : > { %s316_s18 = scalar_lea.vmem [#allocation8], %s1050_s17  ;;  %s471_s28 = sshll.u32 %s467_s11, 4  ;;  %s472_s28 = int_to_ptr.hbm [resolvable:$true] %s471_s28 }
 0x22c   : > { %s469_s15 = sshll.u32 %s316_s18, 4  ;;  %s849_s1 = sshra.s32 %s472_s28, 4  ;;  %s470_s15 = int_to_ptr.vmem [resolvable:$true] %s469_s15  ;;  %s850_s1 = int_to_ptr.hbm [resolvable:$true] %s849_s1 }
 0x22d   : > { %s851_s20 = scalar_lea.hbm %s850_s1, 4  ;;  %s855_s14 = scalar_lea.hbm %s1138_s6, 8 }
 0x22e   : > { %p852_p3 = scmp.ne.s32.totalorder %s850_s1, %s851_s20  ;;  %p856_p7 = scmp.lt.s32.totalorder %s850_s1, %s1138_s6 }
 0x22f   : > { %v412_v40 = vpop.permute.xlu1 %411  ;;  %p857_p9 = scmp.lt.s32.totalorder %s855_s14, %s851_s20 }
 0x230   : > { %414 = vst.msk [vmem:[%s316_s18] sm:$0xf] %vm404_vm5, %v412_v40  ;;  %p853_p5 = pnand %p852_p3, %p1007_p4 }
 0x231   : > { %p858_p10 = por %p857_p9, %p856_p7 }
 0x232   : > { %p854_p6 = pneg %p853_p5 }
 0x234   : > { %p859_p11 = pnand %p858_p10, %p854_p6 }
 0x236   : > { %862 = shalt.err (!%p859_p11)
}
 0x237   : > { %669 = dma.vmem_to_hbm [thread:$0]  (%p1007_p4), %s470_s15, 64, %s472_s28, %s1082_s12  }
 0x238 PF: > { %p689_p12 = scmp.ge.s32.totalorder %s921_s26, 2  ;;  %s483_s19 = sand.u32 1, %s901_s21  }
 0x239   : > { %s484_s11 = scalar_lea.sflag [#allocation4], %s483_s19 }
 0x23a   : > { %p678_p13 = pnand %p689_p12, %p1016_p8 }
 0x23c   : > { %p679_p0 = pneg %p678_p13 }
 0x23e   : > { %892 = dma.done.wait (%p679_p0), %s484_s11, 64  }
 0x23f   : > { %894 = vsyncadd (%p679_p0), %s484_s11, 4294967232  ;;  %s1146_s27 = sadd.s32 4294967294, %s921_s26  }
 0x240   : > { %s493_s8 = sand.u32 1, %s1146_s27  }
 0x241   : > { %s494_s13 = scalar_lea.sflag [#allocation7], %s493_s8 }
 0x242   : > { %896 = dma.done.wait (%p679_p0), %s494_s13, 128  }
 0x243   : > { %898 = vsyncadd (%p679_p0), %s494_s13, 4294967168  ;;  %s24_s26 = sadd.s32 1, %s921_s26   ;;  %s1147_s21 = smov %s905_s22 }
 0x244   : > { %p21_p4 = scmp.ge.s32.totalorder %s24_s26, 4   ;;  %s1148_s22 = smov %s909_s23 }
 0x245   : > { %s1149_s23 = smov %s1022_s10  ;;  %s1150_s24 = smov %s917_s25 }
 0x246   : > { %s1151_s25 = smov %s1153_s29  ;;  %23 = sbr.rel (!%p21_p4) target bundleno = 10 (0xa), region = 111 }
 0x24b   :  { %510 = vsyncpa [#allocation3], 1 }
 0x24c   :  { %512 = vsyncpa [#allocation3 + $0x1], 1 }
 0x24d   :  { %513 = vsyncpa [#allocation4], 1 }
 0x24e   :  { %515 = vsyncpa [#allocation4 + $0x1], 1 }
 0x24f   :  { %516 = vsyncpa [#allocation7], 1 }
 0x250   :  { %518 = vsyncpa [#allocation7 + $0x1], 1 }

</bundles_post_ra>
